<compile_context>
chip_gen: v7x
topology: tpu7x:2x2x1
jax: 0.10.0
libtpu: 0.0.40
codegen_flags: <defaults>
</compile_context>

<pallas_src>
import math

import jax
import jax.numpy as jnp
from jax.experimental import pallas as pl
from jax.experimental.pallas import tpu as pltpu


_COLS = 1024          # lane-dense last dim (multiple of 128)
_MAX_TILE_ROWS = 512  # 512 x 1024 f32 = 2 MiB per buffer per block


def rrn_kernel(thr_ref, x_ref, bits_ref, o_ref):
    """One (tile_rows, 1024) tile: build Laplace*Bernoulli noise, add, clamp."""
    ubits = bits_ref[...]                                           # uint32

    # --- Laplace(0, 1) via inverse CDF, uniform from the top 23 bits -------
    mant = (ubits >> jnp.uint32(9)) | jnp.uint32(0x3F800000)        # [1, 2)
    u1 = jax.lax.bitcast_convert_type(mant, jnp.float32) - jnp.float32(1.0)
    u = u1 - jnp.float32(0.5)                                       # [-0.5, 0.5)
    one_minus = jnp.maximum(
        jnp.float32(1.0) - jnp.float32(2.0) * jnp.abs(u), jnp.float32(1e-30))
    lap_mag = -jnp.log(one_minus)                                   # >= 0 (EUP)
    lap = jnp.where(u >= jnp.float32(0.0), lap_mag, -lap_mag)

    # --- Bernoulli(1 - p) keep-mask from the low 9 bits ---------------------
    keep = (ubits & jnp.uint32(0x1FF)).astype(jnp.int32) < thr_ref[0]
    noise = jnp.where(keep, lap, jnp.float32(0.0))

    o_ref[...] = jnp.clip(
        x_ref[...].astype(jnp.float32) + noise,
        jnp.float32(0.0), jnp.float32(1.0)).astype(o_ref.dtype)


def rrn_pallas(x, eps, seed=0):
    """Pallas implementation of algorithm.forward(x, eps)."""
    p = math.exp(eps) / (1.0 + math.exp(eps))
    # Bernoulli keep-probability (1 - p), quantized to 1/512 steps.
    thr = int(round(512.0 * (1.0 - p)))
    thr = max(0, min(512, thr))
    thr_arr = jnp.asarray([thr], dtype=jnp.int32)

    orig_shape = x.shape
    orig_dtype = x.dtype
    total = int(x.size)

    # Lane-dense 2D layout, fixed-size row tiles.
    rows = -(-total // _COLS)
    tile_rows = min(_MAX_TILE_ROWS, max(8, ((rows + 7) // 8) * 8))
    grid_r = -(-rows // tile_rows)
    padded_rows = grid_r * tile_rows
    padded_total = padded_rows * _COLS

    xf = jnp.ravel(x)
    if padded_total != total:
        xf = jnp.pad(xf, (0, padded_total - total))
    x2 = xf.reshape(padded_rows, _COLS)

    # One 32-bit random word per element (replaces the two numpy draws).
    bits = jax.random.bits(jax.random.PRNGKey(seed), x2.shape, dtype=jnp.uint32)

    cost = pl.CostEstimate(
        flops=12 * padded_total,
        transcendentals=padded_total,
        bytes_accessed=2 * x2.size * x2.dtype.itemsize + bits.size * 4,
    )

    out2 = pl.pallas_call(
        rrn_kernel,
        out_shape=jax.ShapeDtypeStruct(x2.shape, orig_dtype),
        grid=(grid_r,),
        in_specs=[
            pl.BlockSpec(memory_space=pltpu.MemorySpace.SMEM),       # threshold
            pl.BlockSpec((tile_rows, _COLS), lambda i: (i, 0)),      # x tile
            pl.BlockSpec((tile_rows, _COLS), lambda i: (i, 0)),      # random bits
        ],
        out_specs=pl.BlockSpec((tile_rows, _COLS), lambda i: (i, 0)),
        compiler_params=pltpu.CompilerParams(
            dimension_semantics=("parallel",)),
        cost_estimate=cost,
    )(thr_arr, x2, bits)

    return out2.reshape(-1)[:total].reshape(orig_shape).astype(orig_dtype)


if __name__ == "__main__":
    key = jax.random.PRNGKey(0)
    B, C, S = 2, 4, 16
    x = jax.random.uniform(key, (B, C, S, S), dtype=jnp.float32)
    eps = 1.0

    out = rrn_pallas(x, eps, seed=0)
    out = jax.block_until_ready(out)

    assert out.shape == x.shape, f"shape mismatch: {out.shape} vs {x.shape}"
    assert out.dtype == x.dtype, f"dtype mismatch: {out.dtype} vs {x.dtype}"
    assert bool(jnp.all(out >= 0.0)) and bool(jnp.all(out <= 1.0)), "clamp failed"

    print("KERNEL_OK")
</pallas_src>

<mosaic_0001>
module attributes {stable_mosaic.version = 11 : i64} {
  func.func @rrn_kernel(%arg0: i32, %arg1: memref<1xi32, #tpu.memory_space<smem>>, %arg2: memref<8x1024xf32, #tpu.memory_space<vmem>>, %arg3: memref<8x1024xi32, #tpu.memory_space<vmem>>, %arg4: memref<8x1024xf32, #tpu.memory_space<vmem>>) attributes {dimension_semantics = [#tpu.dimension_semantics<parallel>], iteration_bounds = array<i64: 1>, scalar_prefetch = 0 : i64, scratch_operands = 0 : i64, tpu.core_type = #tpu.core_type<tc>, window_params = [{transform_indices = @transform_0, window_bounds = array<i64: 1>}, {transform_indices = @transform_1, window_bounds = array<i64: 8, 1024>}, {transform_indices = @transform_2, window_bounds = array<i64: 8, 1024>}, {transform_indices = @transform_3, window_bounds = array<i64: 8, 1024>}]} {
    %c0 = arith.constant 0 : index
    %c0_0 = arith.constant 0 : index
    %0 = vector.load %arg3[%c0, %c0_0] : memref<8x1024xi32, #tpu.memory_space<vmem>>, vector<8x1024xi32>
    %c9_i32 = arith.constant 9 : i32
    %1 = vector.broadcast %c9_i32 : i32 to vector<8x1024xi32>
    %2 = arith.shrui %0, %1 : vector<8x1024xi32>
    %c1065353216_i32 = arith.constant 1065353216 : i32
    %3 = vector.broadcast %c1065353216_i32 : i32 to vector<8x1024xi32>
    %4 = arith.ori %2, %3 : vector<8x1024xi32>
    %5 = tpu.bitcast %4 : vector<8x1024xi32> -> vector<8x1024xf32>
    %cst = arith.constant 1.000000e+00 : f32
    %6 = vector.broadcast %cst : f32 to vector<8x1024xf32>
    %7 = arith.subf %5, %6 : vector<8x1024xf32>
    %cst_1 = arith.constant 5.000000e-01 : f32
    %8 = vector.broadcast %cst_1 : f32 to vector<8x1024xf32>
    %9 = arith.subf %7, %8 : vector<8x1024xf32>
    %10 = math.absf %9 : vector<8x1024xf32>
    %cst_2 = arith.constant 2.000000e+00 : f32
    %11 = vector.broadcast %cst_2 : f32 to vector<8x1024xf32>
    %12 = arith.mulf %11, %10 : vector<8x1024xf32>
    %cst_3 = arith.constant 1.000000e+00 : f32
    %13 = vector.broadcast %cst_3 : f32 to vector<8x1024xf32>
    %14 = arith.subf %13, %12 : vector<8x1024xf32>
    %cst_4 = arith.constant 1.000000e-30 : f32
    %15 = vector.broadcast %cst_4 : f32 to vector<8x1024xf32>
    %16 = arith.maximumf %14, %15 : vector<8x1024xf32>
    %17 = math.log %16 : vector<8x1024xf32>
    %cst_5 = arith.constant 0.000000e+00 : f32
    %18 = vector.broadcast %cst_5 : f32 to vector<8x1024xf32>
    %19 = arith.subf %18, %17 : vector<8x1024xf32>
    %cst_6 = arith.constant 0.000000e+00 : f32
    %20 = vector.broadcast %cst_6 : f32 to vector<8x1024xf32>
    %21 = arith.cmpf oge, %9, %20 : vector<8x1024xf32>
    %cst_7 = arith.constant 0.000000e+00 : f32
    %22 = vector.broadcast %cst_7 : f32 to vector<8x1024xf32>
    %23 = arith.subf %22, %19 : vector<8x1024xf32>
    %24 = arith.select %21, %19, %23 : vector<8x1024xi1>, vector<8x1024xf32>
    %c511_i32 = arith.constant 511 : i32
    %25 = vector.broadcast %c511_i32 : i32 to vector<8x1024xi32>
    %26 = arith.andi %0, %25 : vector<8x1024xi32>
    %c0_8 = arith.constant 0 : index
    %27 = memref.load %arg1[%c0_8] : memref<1xi32, #tpu.memory_space<smem>>
    %28 = vector.broadcast %27 : i32 to vector<8x1024xi32>
    %29 = arith.cmpi slt, %26, %28 : vector<8x1024xi32>
    %cst_9 = arith.constant 0.000000e+00 : f32
    %30 = vector.broadcast %cst_9 : f32 to vector<8x1024xf32>
    %31 = arith.select %29, %24, %30 : vector<8x1024xi1>, vector<8x1024xf32>
    %c0_10 = arith.constant 0 : index
    %c0_11 = arith.constant 0 : index
    %32 = vector.load %arg2[%c0_10, %c0_11] : memref<8x1024xf32, #tpu.memory_space<vmem>>, vector<8x1024xf32>
    %33 = arith.addf %32, %31 : vector<8x1024xf32>
    %cst_12 = arith.constant 0.000000e+00 : f32
    %cst_13 = arith.constant 1.000000e+00 : f32
    %34 = vector.broadcast %cst_12 : f32 to vector<8x1024xf32>
    %35 = arith.maximumf %34, %33 : vector<8x1024xf32>
    %36 = vector.broadcast %cst_13 : f32 to vector<8x1024xf32>
    %37 = arith.minimumf %36, %35 : vector<8x1024xf32>
    %c0_14 = arith.constant 0 : index
    %c0_15 = arith.constant 0 : index
    %38 = vector.load %arg4[%c0_14, %c0_15] : memref<8x1024xf32, #tpu.memory_space<vmem>>, vector<8x1024xf32>
    tpu.vector_store %arg4[%c0_14, %c0_15], %37 {strides = array<i32>} : memref<8x1024xf32, #tpu.memory_space<vmem>>, vector<8x1024xf32>,
    return
  }
  func.func @transform_0(%arg0: i32) -> i32 {
    %c0_i32 = arith.constant 0 : i32
    %c0_i32_0 = arith.constant 0 : i32
    return %c0_i32 : i32
  }
  func.func @transform_1(%arg0: i32) -> (i32, i32) {
    %c0_i32 = arith.constant 0 : i32
    %c0_i32_0 = arith.constant 0 : i32
    return %arg0, %c0_i32 : i32, i32
  }
  func.func @transform_2(%arg0: i32) -> (i32, i32) {
    %c0_i32 = arith.constant 0 : i32
    %c0_i32_0 = arith.constant 0 : i32
    return %arg0, %c0_i32 : i32, i32
  }
  func.func @transform_3(%arg0: i32) -> (i32, i32) {
    %c0_i32 = arith.constant 0 : i32
    %c0_i32_0 = arith.constant 0 : i32
    return %arg0, %c0_i32 : i32, i32
  }
}

</mosaic_0001>

<bundles_post_ra>
// kernel: tpu_custom_call.1
= control target key start
LH: loop header
LB: loop body
LE: loop exit
PB: predicated region body
PF: predicated region fallthrough
CT: control target
= control target key end

     0   :  { %9 = vsyncpa [#allocation4], 0  ;;  %s541_s0 = inlined_call_operand.<no memory space> [shape: s32[1], index: 0, kind: input, shape index: {}]   ;;  %s542_s1 = inlined_call_operand.hbm [shape: f32[8,1024], index: 1, kind: input, shape index: {}]   ;;  %s543_s2 = inlined_call_operand.hbm [shape: u32[8,1024], index: 2, kind: input, shape index: {}]   ;;  %s544_s3 = inlined_call_operand.hbm [shape: f32[8,1024], index: 3, kind: output, shape index: {}]  }
   0x1   :  { %10 = vsyncpa [#allocation7], 0 }
   0x2   :  { %11 = vsyncpa [#allocation5], 0  ;;  %s357_s12 = smov [#allocation3]   ;;  %s358_s14 = smov [#allocation6]  }
   0x3   :  { %s20_s13 = sshll.u32 %s357_s12, 4  ;;  %s30_s15 = sshll.u32 %s358_s14, 4  ;;  %s21_s13 = int_to_ptr.vmem [resolvable:$true] %s20_s13  ;;  %s31_s15 = int_to_ptr.vmem [resolvable:$true] %s30_s15 }
   0x4   :  { %s285_s18 = scalar_lea.hbm %s542_s1, 1024 }
   0x5   :  { %p286_p0 = scmp.ne.s32.totalorder %s542_s1, %s285_s18  ;;  %p289_p1 = scmp.lt.u32.totalorder %s285_s18, %s542_s1 }
   0x7   :  { %p291_p2 = pnand %p289_p1, %p286_p0 }
   0x9   :  { %294 = shalt.err (!%p291_p2)
}
   0xa   :  { %s295_s23 = scalar_lea.vmem %s21_s13, 1024  ;;  %p300_p4 = scmp.lt.s32.totalorder %s21_s13, %s21_s13 }
   0xb   :  { %p296_p3 = scmp.ne.s32.totalorder %s21_s13, %s295_s23  ;;  %p301_p5 = scmp.lt.s32.totalorder %s295_s23, %s295_s23 }
   0xd   :  { %p302_p6 = por %p301_p5, %p300_p4 }
   0xf   :  { %p303_p7 = pnand %p302_p6, %p296_p3 }
  0x11   :  { %306 = shalt.err (!%p303_p7)
}
  0x12   :  { %23 = dma.hbm_to_vmem [thread:$0]  %s542_s1, 1024, %s21_s13, [#allocation4]  }
  0x13   :  { %s307_s28 = scalar_lea.hbm %s543_s2, 1024 }
  0x14   :  { %p308_p8 = scmp.ne.s32.totalorder %s543_s2, %s307_s28  ;;  %p311_p9 = scmp.lt.u32.totalorder %s307_s28, %s543_s2 }
  0x16   :  { %p313_p10 = pnand %p311_p9, %p308_p8 }
  0x18   :  { %316 = shalt.err (!%p313_p10)
}
  0x19   :  { %s317_s6 = scalar_lea.vmem %s31_s15, 1024  ;;  %p322_p12 = scmp.lt.s32.totalorder %s31_s15, %s31_s15 }
  0x1a   :  { %p318_p11 = scmp.ne.s32.totalorder %s31_s15, %s317_s6  ;;  %p323_p13 = scmp.lt.s32.totalorder %s317_s6, %s317_s6 }
  0x1c   :  { %p324_p0 = por %p323_p13, %p322_p12 }
  0x1e   :  { %p325_p1 = pnand %p324_p0, %p318_p11 }
  0x20   :  { %328 = shalt.err (!%p325_p1)
}
  0x21   :  { %33 = dma.hbm_to_vmem [thread:$0]  %s543_s2, 1024, %s31_s15, [#allocation7]  }
  0x22   :  { %351 = dma.done.wait [#allocation4], 1024  }
  0x23   :  { %352 = vsyncadd [#allocation4], 4294966272 }
  0x24   :  { %353 = dma.done.wait [#allocation7], 1024  }
  0x25   :  { %354 = vsyncadd [#allocation7], 4294966272  ;;  %v404_v0 = vld [vmem:[#allocation6] sm:$0xff]  ;;  %v406_v1 = vld [vmem:[#allocation6 + $0x8] sm:$0xff] }
  0x26   :  { %v48_v2 = vshrl.u32 %v404_v0, 9  ;;  %v49_v3 = vshrl.u32 %v406_v1, 9  ;;  %v410_v4 = vld [vmem:[#allocation6 + $0x10] sm:$0xff]  ;;  %v413_v6 = vld [vmem:[#allocation6 + $0x18] sm:$0xff]  ;;  %v415_v9 = vld [vmem:[#allocation6 + $0x20] sm:$0xff]  ;;  %v168_v62 = vand.u32 511, %v404_v0 }
  0x27   :  { %v50_v5 = vshrl.u32 %v410_v4, 9  ;;  %v417_v10 = vld [vmem:[#allocation6 + $0x28] sm:$0xff]  ;;  %v51_v12 = vshrl.u32 %v413_v6, 9  ;;  %v52_v15 = vshrl.u32 %v415_v9, 9  ;;  %v433_v30 = vld [vmem:[#allocation6 + $0x30] sm:$0xff]  ;;  %v442_v44 = vld [vmem:[#allocation6 + $0x38] sm:$0xff] }
  0x28   :  { %v56_v7 = vor.u32 1065353216, %v48_v2  ;;  %v57_v8 = vor.u32 1065353216, %v49_v3  ;;  %v53_v18 = vshrl.u32 %v417_v10, 9  ;;  %v54_v40 = vshrl.u32 %v433_v30, 9 }
  0x29   :  { %v58_v11 = vor.u32 1065353216, %v50_v5  ;;  %v59_v17 = vor.u32 1065353216, %v51_v12  ;;  %v60_v21 = vor.u32 1065353216, %v52_v15  ;;  %v55_v55 = vshrl.u32 %v442_v44, 9 }
  0x2a   :  { %v250_v13 = vadd.f32 -1.0, %v56_v7  ;;  %v251_v14 = vadd.f32 -1.0, %v57_v8  ;;  %v61_v24 = vor.u32 1065353216, %v53_v18  ;;  %v62_v52 = vor.u32 1065353216, %v54_v40 }
  0x2b   :  { %v252_v16 = vadd.f32 -1.0, %v58_v11  ;;  %v253_v23 = vadd.f32 -1.0, %v59_v17  ;;  %v254_v29 = vadd.f32 -1.0, %v60_v21  ;;  %v63_v59 = vor.u32 1065353216, %v55_v55 }
  0x2c   :  { %v422_v19 = vadd.f32 -0.5, %v250_v13  ;;  %v424_v20 = vadd.f32 -0.5, %v251_v14  ;;  %v255_v33 = vadd.f32 -1.0, %v61_v24  ;;  %v256_v57 = vadd.f32 -1.0, %v62_v52 }
  0x2d   :  { %v426_v22 = vadd.f32 -0.5, %v252_v16  ;;  %v431_v28 = vadd.f32 -0.5, %v253_v23  ;;  %v436_v36 = vadd.f32 -0.5, %v254_v29  ;;  %v257_v63 = vadd.f32 -1.0, %v63_v59 }
  0x2e   :  { %v88_v25 = vand.u32 2147483647, %v422_v19  ;;  %v89_v26 = vand.u32 2147483647, %v424_v20  ;;  %v438_v39 = vadd.f32 -0.5, %v255_v33  ;;  %v446_v61 = vadd.f32 -0.5, %v256_v57 }
  0x2f   :  { %v90_v27 = vand.u32 2147483647, %v426_v22  ;;  %v91_v35 = vand.u32 2147483647, %v431_v28  ;;  %v92_v43 = vand.u32 2147483647, %v436_v36  ;;  %v455_v7 = vstv %s541_s0 }
  0x30   :  { %v96_v31 = vmul.f32 2.0, %v88_v25  ;;  %v97_v32 = vmul.f32 2.0, %v89_v26  ;;  %v93_v47 = vand.u32 2147483647, %v438_v39  ;;  %v169_v2 = vand.u32 511, %v406_v1  ;;  %s359_s0 = smov [#allocation8]  }
  0x31   :  { %v98_v34 = vmul.f32 2.0, %v90_v27  ;;  %v99_v42 = vmul.f32 2.0, %v91_v35  ;;  %v100_v50 = vmul.f32 2.0, %v92_v43  ;;  %v170_v3 = vand.u32 511, %v410_v4  ;;  %s240_s9 = sshll.u32 %s359_s0, 4  ;;  %s241_s9 = int_to_ptr.vmem [resolvable:$true] %s240_s9 }
  0x32   :  { %v104_v37 = vsub.f32 1.0, %v96_v31  ;;  %v105_v38 = vsub.f32 1.0, %v97_v32  ;;  %v101_v51 = vmul.f32 2.0, %v93_v47  ;;  %v94_v5 = vand.u32 2147483647, %v446_v61  ;;  %s329_s10 = scalar_lea.vmem %s241_s9, 1024  ;;  %p334_p3 = scmp.lt.s32.totalorder %s241_s9, %s241_s9 }
  0x33   :  { %v106_v41 = vsub.f32 1.0, %v98_v34  ;;  %v107_v49 = vsub.f32 1.0, %v99_v42  ;;  %v108_v54 = vsub.f32 1.0, %v100_v50  ;;  %v171_v8 = vand.u32 511, %v413_v6  ;;  %v194_v42 = vld [vmem:[#allocation3] sm:$0xff]  ;;  %p330_p2 = scmp.ne.s32.totalorder %s241_s9, %s329_s10  ;;  %p335_p4 = scmp.lt.s32.totalorder %s329_s10, %s329_s10 }
  0x34   :  { %v112_v45 = vmax.f32 %v104_v37, 1e-30  ;;  %v113_v46 = vmax.f32 %v105_v38, 1e-30  ;;  %v109_v56 = vsub.f32 1.0, %v101_v51  ;;  %v458_v11 = vadd.f32 -0.5, %v257_v63 }
  0x35   :  { %v114_v48 = vmax.f32 %v106_v41, 1e-30  ;;  %v115_v53 = vmax.f32 %v107_v49, 1e-30  ;;  %v116_v58 = vmax.f32 %v108_v54, 1e-30  ;;  %vm464_vm0 = vcmp.lt.s32.totalorder %v168_v62, %v455_v7  ;;  %p336_p5 = por %p335_p4, %p334_p3 }
  0x36   :  { %269 = vlog2.f32 %v112_v45  ;;  %v117_v60 = vmax.f32 %v109_v56, 1e-30  ;;  %v172_v0 = vand.u32 511, %v415_v9  ;;  %v102_v12 = vmul.f32 2.0, %v94_v5 }
  0x37   :  { %271 = vlog2.f32 %v113_v46  ;;  %v173_v13 = vand.u32 511, %v417_v10  ;;  %v95_v1 = vand.u32 2147483647, %v458_v11  ;;  %vm469_vm1 = vcmp.lt.s32.totalorder %v169_v2, %v455_v7  ;;  %p337_p6 = pnand %p336_p5, %p330_p2 }
  0x38   :  { %273 = vlog2.f32 %v114_v48  ;;  %vm474_vm2 = vcmp.lt.s32.totalorder %v170_v3, %v455_v7  ;;  %v110_v9 = vsub.f32 1.0, %v102_v12  ;;  %vm144_vm3 = vcmp.ge.f32.partialorder %v422_v19, 0.0  ;;  %v195_v48 = vld [vmem:[#allocation3 + $0x8] sm:$0xff] }
  0x39   :  { %275 = vlog2.f32 %v115_v53  ;;  %vm480_vm4 = vcmp.lt.s32.totalorder %v171_v8, %v455_v7  ;;  %v103_v18 = vmul.f32 2.0, %v95_v1  ;;  %vm145_vm5 = vcmp.ge.f32.partialorder %v424_v20, 0.0  ;;  %v196_v53 = vld [vmem:[#allocation3 + $0x10] sm:$0xff]  ;;  %v198_v8 = vld [vmem:[#allocation3 + $0x20] sm:$0xff]  ;;  %v199_v1 = vld [vmem:[#allocation3 + $0x28] sm:$0xff] }
  0x3a   :  { %277 = vlog2.f32 %v116_v58  ;;  %vm146_vm6 = vcmp.ge.f32.partialorder %v426_v22, 0.0  ;;  %vm487_vm7 = vcmp.lt.s32.totalorder %v172_v0, %v455_v7  ;;  %v118_v25 = vmax.f32 %v110_v9, 1e-30  ;;  %v197_v58 = vld [vmem:[#allocation3 + $0x18] sm:$0xff] }
  0x3b   :  { %279 = vlog2.f32 %v117_v60  ;;  %vm492_vm8 = vcmp.lt.s32.totalorder %v173_v13, %v455_v7  ;;  %v111_v32 = vsub.f32 1.0, %v103_v18  ;;  %vm147_vm9 = vcmp.ge.f32.partialorder %v431_v28, 0.0 }
  0x3c   :  { %281 = vlog2.f32 %v118_v25  ;;  %vm148_vm10 = vcmp.ge.f32.partialorder %v436_v36, 0.0  ;;  %vm149_vm11 = vcmp.ge.f32.partialorder %v438_v39, 0.0  ;;  %vm150_vm12 = vcmp.ge.f32.partialorder %v446_v61, 0.0  ;;  %v201_v61 = vld [vmem:[#allocation3 + $0x38] sm:$0xff] }
  0x3d   :  { %v119_v40 = vmax.f32 %v111_v32, 1e-30  ;;  %v175_v31 = vand.u32 511, %v442_v44  ;;  %vm151_vm14 = vcmp.ge.f32.partialorder %v458_v11, 0.0 }
  0x3f   :  { %283 = vlog2.f32 %v119_v40  ;;  %vm185_vm15 = vcmp.lt.s32.totalorder %v175_v31, %v455_v7 }
  0x40   :  { %v270_v4 = vpop.eup %269 }
  0x41   :  { %v272_v10 = vpop.eup %271  ;;  %v121_v16 = vmul.f32 0.6931472, %v270_v4 }
  0x42   :  { %v274_v21 = vpop.eup %273  ;;  %v123_v23 = vmul.f32 0.6931472, %v272_v10 }
  0x43   :  { %v276_v26 = vpop.eup %275  ;;  %v136_v27 = vsub.f32 0.0, %v121_v16  ;;  %v125_v29 = vmul.f32 0.6931472, %v274_v21 }
  0x44   :  { %v137_v33 = vsub.f32 0.0, %v123_v23  ;;  %v127_v34 = vmul.f32 0.6931472, %v276_v26  ;;  %v278_v35 = vpop.eup %277  ;;  %v174_v23 = vand.u32 511, %v433_v30  ;;  %v200_v30 = vld [vmem:[#allocation3 + $0x30] sm:$0xff] }
  0x45   :  { %v152_v37 = vsub.f32 0.0, %v136_v27  ;;  %v138_v38 = vsub.f32 0.0, %v125_v29  ;;  %v280_v41 = vpop.eup %279  ;;  %v129_v46 = vmul.f32 0.6931472, %v278_v35 }
  0x46   :  { %v153_v43 = vsub.f32 0.0, %v137_v33  ;;  %v139_v45 = vsub.f32 0.0, %v127_v34  ;;  %v131_v50 = vmul.f32 0.6931472, %v280_v41  ;;  %v282_v6 = vpop.eup %281  ;;  %vm184_vm13 = vcmp.lt.s32.totalorder %v174_v23, %v455_v7 }
  0x47   :  { %v160_v47 = vsel %vm144_vm3, %v136_v27, %v152_v37  ;;  %v154_v49 = vsub.f32 0.0, %v138_v38  ;;  %v140_v55 = vsub.f32 0.0, %v129_v46  ;;  %v133_v21 = vmul.f32 0.6931472, %v282_v6 }
  0x48   :  { %v186_v51 = vsel %vm464_vm0, %v160_v47, 0.0  ;;  %v161_v52 = vsel %vm145_vm5, %v137_v33, %v153_v43  ;;  %v155_v54 = vsub.f32 0.0, %v139_v45  ;;  %v141_v59 = vsub.f32 0.0, %v131_v50 }
  0x49   :  { %v202_v56 = vadd.f32 %v194_v42, %v186_v51  ;;  %v187_v57 = vsel %vm469_vm1, %v161_v52, 0.0  ;;  %v162_v19 = vsel %vm146_vm6, %v138_v38, %v154_v49  ;;  %v156_v63 = vsub.f32 0.0, %v140_v55  ;;  %v284_v26 = vpop.eup %283 }
  0x4a   :  { %v203_v60 = vadd.f32 %v195_v48, %v187_v57  ;;  %v188_v62 = vsel %vm474_vm2, %v162_v19, 0.0  ;;  %v163_v20 = vsel %vm147_vm9, %v139_v45, %v155_v54  ;;  %v157_v0 = vsub.f32 0.0, %v141_v59 }
  0x4b   :  { %v210_v2 = vmax.f32 %v202_v56, 0.0  ;;  %v204_v3 = vadd.f32 %v196_v53, %v188_v62  ;;  %v189_v5 = vsel %vm480_vm4, %v163_v20, 0.0  ;;  %v164_v13 = vsel %vm148_vm10, %v140_v55, %v156_v63 }
  0x4c   :  { %v211_v12 = vmax.f32 %v203_v60, 0.0  ;;  %v205_v22 = vadd.f32 %v197_v58, %v189_v5  ;;  %v190_v28 = vsel %vm487_vm7, %v164_v13, 0.0  ;;  %v165_v15 = vsel %vm149_vm11, %v141_v59, %v157_v0 }
  0x4d   :  { %v218_v4 = vmin.f32 %v210_v2, 1.0  ;;  %v212_v14 = vmax.f32 %v204_v3, 0.0  ;;  %v206_v16 = vadd.f32 %v198_v8, %v190_v28  ;;  %v191_v17 = vsel %vm492_vm8, %v165_v15, 0.0 }
  0x4e   :  { %v219_v9 = vmin.f32 %v211_v12, 1.0  ;;  %v213_v10 = vmax.f32 %v205_v22, 0.0  ;;  %v207_v36 = vadd.f32 %v199_v1, %v191_v17  ;;  %v142_v27 = vsub.f32 0.0, %v133_v21 }
  0x4f   :  { %226 = vst [vmem:[#allocation8] sm:$0xff] %v218_v4  ;;  %v220_v18 = vmin.f32 %v212_v14, 1.0  ;;  %v214_v24 = vmax.f32 %v206_v16, 0.0  ;;  %v135_v32 = vmul.f32 0.6931472, %v284_v26 }
  0x50   :  { %227 = vst [vmem:[#allocation8 + $0x8] sm:$0xff] %v219_v9  ;;  %v221_v25 = vmin.f32 %v213_v10, 1.0  ;;  %v215_v39 = vmax.f32 %v207_v36, 0.0  ;;  %v158_v34 = vsub.f32 0.0, %v142_v27 }
  0x51   :  { %228 = vst [vmem:[#allocation8 + $0x10] sm:$0xff] %v220_v18  ;;  %v222_v29 = vmin.f32 %v214_v24, 1.0  ;;  %v143_v35 = vsub.f32 0.0, %v135_v32 }
  0x52   :  { %229 = vst [vmem:[#allocation8 + $0x18] sm:$0xff] %v221_v25  ;;  %v223_v33 = vmin.f32 %v215_v39, 1.0  ;;  %v166_v37 = vsel %vm150_vm12, %v142_v27, %v158_v34 }
  0x53   :  { %230 = vst [vmem:[#allocation8 + $0x20] sm:$0xff] %v222_v29  ;;  %v192_v38 = vsel %vm184_vm13, %v166_v37, 0.0  ;;  %v159_v40 = vsub.f32 0.0, %v143_v35 }
  0x54   :  { %231 = vst [vmem:[#allocation8 + $0x28] sm:$0xff] %v223_v33  ;;  %v208_v41 = vadd.f32 %v200_v30, %v192_v38 }
  0x55   :  { %v167_v42 = vsel %vm151_vm14, %v143_v35, %v159_v40 }
  0x56   :  { %v216_v43 = vmax.f32 %v208_v41, 0.0  ;;  %v193_v44 = vsel %vm185_vm15, %v167_v42, 0.0 }
  0x57   :  { %v209_v45 = vadd.f32 %v201_v61, %v193_v44 }
  0x58   :  { %v224_v46 = vmin.f32 %v216_v43, 1.0 }
  0x59   :  { %v217_v47 = vmax.f32 %v209_v45, 0.0 }
  0x5a   :  { %232 = vst [vmem:[#allocation8 + $0x30] sm:$0xff] %v224_v46 }
  0x5b   :  { %v225_v48 = vmin.f32 %v217_v47, 1.0 }
  0x5d   :  { %233 = vst [vmem:[#allocation8 + $0x38] sm:$0xff] %v225_v48 }
  0x5e   :  { %340 = shalt.err (!%p337_p6)
}
  0x5f   :  { %s341_s13 = scalar_lea.hbm %s544_s3, 1024 }
  0x60   :  { %p342_p7 = scmp.ne.s32.totalorder %s544_s3, %s341_s13  ;;  %p345_p8 = scmp.lt.u32.totalorder %s341_s13, %s544_s3 }
  0x62   :  { %p347_p9 = pnand %p345_p8, %p342_p7 }
  0x64   :  { %350 = shalt.err (!%p347_p9)
}
  0x65   :  { %243 = dma.vmem_to_hbm [thread:$0]  %s241_s9, 1024, %s544_s3, [#allocation5]  }
  0x66   :  { %355 = dma.done.wait [#allocation5], 1024  }
  0x67   :  { %356 = vsyncadd [#allocation5], 4294966272 }
  0x68   :  { %247 = vsyncpa [#allocation4], 1 }
  0x69   :  { %248 = vsyncpa [#allocation7], 1 }
  0x6a   :  { %249 = vsyncpa [#allocation5], 1 }

</bundles_post_ra>
